<compile_context>
chip_gen: v7x
topology: tpu7x:2x2x1
jax: 0.10.0
libtpu: 0.0.40
codegen_flags: <defaults>
</compile_context>

<pallas_src>
import functools

import jax
import jax.numpy as jnp
from jax.experimental import pallas as pl
from jax.experimental.pallas import tpu as pltpu


def _round_up(x: int, m: int) -> int:
    return ((x + m - 1) // m) * m


def _vmem_capacity_bytes() -> int:
    # Physical VMEM per TensorCore; conservative fallback = v7x (64 MiB).
    try:
        return int(pltpu.get_tpu_info().vmem_capacity_bytes)
    except Exception:
        return 64 * 1024 * 1024


def _rmsnorm_kernel(x_ref, w_ref, o_ref, *, eps: float, inv_hidden: float):
    # Hot path: square, sum over hidden, rsqrt(mean + eps), scale by (1 + w).
    x = x_ref[...].astype(jnp.float32)                        # (tile, hidden)
    sum_sq = jnp.sum(x * x, axis=-1, keepdims=True)           # (tile, 1)
    inv = jax.lax.rsqrt(sum_sq * inv_hidden + eps)            # (tile, 1)
    # w_ref already holds (1 + weight) in float32, shape (1, hidden).
    o_ref[...] = (x * inv * w_ref[...]).astype(o_ref.dtype)


def gemma_rms_norm(x: jax.Array, weight: jax.Array, eps: float = 1e-6) -> jax.Array:
    """Pallas implementation of GemmaRMSNorm.forward.

    x:      (..., hidden) array (any float dtype)
    weight: (hidden,) parameter
    """
    orig_shape = x.shape
    hidden = orig_shape[-1]
    rows = 1
    for d in orig_shape[:-1]:
        rows *= d

    x2d = x.reshape(rows, hidden)
    # Hoist (1 + weight) in f32 out of the kernel (done once, not per tile).
    w_plus1 = (1.0 + weight.astype(jnp.float32)).reshape(1, hidden)

    itemsize = jnp.dtype(x.dtype).itemsize
    # Sublane packing: 8 rows for 32-bit, 16 for 16-bit, 32 for 8-bit dtypes.
    packing = max(1, 32 // (8 * itemsize)) * 8

    # --- VMEM-budgeted row tile -------------------------------------------
    vmem_cap = _vmem_capacity_bytes()
    # Scoped VMEM limit we request: 3/4 of physical, capped at 96 MiB.
    vmem_limit = min((vmem_cap * 3) // 4, 96 * 1024 * 1024)
    budget = (vmem_limit * 4) // 5  # headroom for weight block, temps, etc.

    # Per-row cost: double-buffered input + double-buffered output block
    # plus f32 upcast / intermediate scratch (counted generously).
    per_row = (2 * hidden * itemsize          # input (double-buffered)
               + 2 * hidden * itemsize        # output (double-buffered)
               + 3 * hidden * 4)              # f32 temporaries

    max_tile = max(packing, budget // per_row)
    tile = (min(max_tile, 1024) // packing) * packing
    tile = max(tile, packing)
    # Never use a tile larger than the (packing-rounded) row count.
    tile = min(tile, _round_up(rows, packing))

    # --- Pad ragged row counts instead of collapsing to one giant block ----
    rows_padded = _round_up(rows, tile)
    if rows_padded != rows:
        # Zero rows are harmless: rsqrt(0 + eps) is finite and 0 * inv = 0.
        x2d = jnp.pad(x2d, ((0, rows_padded - rows), (0, 0)))

    grid = (rows_padded // tile,)

    out2d = pl.pallas_call(
        functools.partial(_rmsnorm_kernel, eps=eps, inv_hidden=1.0 / hidden),
        out_shape=jax.ShapeDtypeStruct((rows_padded, hidden), x.dtype),
        grid_spec=pltpu.PrefetchScalarGridSpec(
            num_scalar_prefetch=0,
            grid=grid,
            in_specs=[
                pl.BlockSpec((tile, hidden), lambda i: (i, 0)),
                pl.BlockSpec((1, hidden), lambda i: (0, 0)),
            ],
            out_specs=pl.BlockSpec((tile, hidden), lambda i: (i, 0)),
        ),
        compiler_params=pltpu.CompilerParams(
            dimension_semantics=("parallel",),
            vmem_limit_bytes=int(vmem_limit),
        ),
    )(x2d, w_plus1)

    if rows_padded != rows:
        out2d = out2d[:rows]
    return out2d.reshape(orig_shape)


def _reference(x, weight, eps=1e-6):
    xf = x.astype(jnp.float32)
    out = xf * jax.lax.rsqrt(jnp.mean(xf * xf, axis=-1, keepdims=True) + eps)
    out = out * (1.0 + weight.astype(jnp.float32))
    return out.astype(x.dtype)


if __name__ == "__main__":
    key = jax.random.PRNGKey(0)
    kx, kw = jax.random.split(key)

    batch, seq, hidden = 2, 8, 32
    x = jax.random.normal(kx, (batch, seq, hidden), dtype=jnp.bfloat16)
    # Module __init__ uses zeros(dim); use a deterministic non-trivial weight
    # so the (1 + weight) scaling path is actually exercised.
    weight = 0.1 * jax.random.normal(kw, (hidden,), dtype=jnp.float32)

    out = gemma_rms_norm(x, weight, eps=1e-6)
    jax.block_until_ready(out)

    ref = _reference(x, weight, eps=1e-6)
    assert out.shape == x.shape and out.dtype == x.dtype
    assert jnp.allclose(out.astype(jnp.float32), ref.astype(jnp.float32),
                        atol=1e-2, rtol=1e-2)

    print("KERNEL_OK")
</pallas_src>

<mosaic_0001>
module attributes {stable_mosaic.version = 11 : i64} {
  func.func @_rmsnorm_kernel(%arg0: i32, %arg1: memref<16x32xbf16, #tpu.memory_space<vmem>>, %arg2: memref<1x32xf32, #tpu.memory_space<vmem>>, %arg3: memref<16x32xbf16, #tpu.memory_space<vmem>>) attributes {dimension_semantics = [#tpu.dimension_semantics<parallel>], iteration_bounds = array<i64: 1>, scalar_prefetch = 0 : i64, scratch_operands = 0 : i64, tpu.core_type = #tpu.core_type<tc>, window_params = [{transform_indices = @transform_0, window_bounds = array<i64: 16, 32>}, {pipeline_mode = #tpu.pipeline_mode<synchronous>, transform_indices = @transform_1, window_bounds = array<i64: 1, 32>}, {transform_indices = @transform_2, window_bounds = array<i64: 16, 32>}]} {
    %c0 = arith.constant 0 : index
    %c0_0 = arith.constant 0 : index
    %0 = vector.load %arg1[%c0, %c0_0] : memref<16x32xbf16, #tpu.memory_space<vmem>>, vector<16x32xbf16>
    %1 = arith.extf %0 : vector<16x32xbf16> to vector<16x32xf32>
    %2 = arith.mulf %1, %1 : vector<16x32xf32>
    %cst = arith.constant dense<0.000000e+00> : vector<16xf32>
    %3 = vector.multi_reduction <add>, %2, %cst [1] : vector<16x32xf32> to vector<16xf32>
    %4 = vector.shape_cast %3 : vector<16xf32> to vector<16x1xf32>
    %cst_1 = arith.constant 3.125000e-02 : f32
    %5 = vector.broadcast %cst_1 : f32 to vector<16x1xf32>
    %6 = arith.mulf %4, %5 : vector<16x1xf32>
    %cst_2 = arith.constant 9.99999997E-7 : f32
    %7 = vector.broadcast %cst_2 : f32 to vector<16x1xf32>
    %8 = arith.addf %6, %7 : vector<16x1xf32>
    %9 = math.rsqrt %8 : vector<16x1xf32>
    %10 = vector.broadcast %9 : vector<16x1xf32> to vector<16x32xf32>
    %11 = arith.mulf %1, %10 : vector<16x32xf32>
    %c0_3 = arith.constant 0 : index
    %c0_4 = arith.constant 0 : index
    %12 = vector.load %arg2[%c0_3, %c0_4] : memref<1x32xf32, #tpu.memory_space<vmem>>, vector<1x32xf32>
    %13 = vector.broadcast %12 : vector<1x32xf32> to vector<16x32xf32>
    %14 = arith.mulf %11, %13 : vector<16x32xf32>
    %15 = arith.truncf %14 : vector<16x32xf32> to vector<16x32xbf16>
    %c0_5 = arith.constant 0 : index
    %c0_6 = arith.constant 0 : index
    %16 = vector.load %arg3[%c0_5, %c0_6] : memref<16x32xbf16, #tpu.memory_space<vmem>>, vector<16x32xbf16>
    tpu.vector_store %arg3[%c0_5, %c0_6], %15 {strides = array<i32>} : memref<16x32xbf16, #tpu.memory_space<vmem>>, vector<16x32xbf16>,
    return
  }
  func.func @transform_0(%arg0: i32) -> (i32, i32) {
    %c0_i32 = arith.constant 0 : i32
    %c0_i32_0 = arith.constant 0 : i32
    return %arg0, %c0_i32 : i32, i32
  }
  func.func @transform_1(%arg0: i32) -> (i32, i32) {
    %c0_i32 = arith.constant 0 : i32
    %c0_i32_0 = arith.constant 0 : i32
    %c0_i32_1 = arith.constant 0 : i32
    return %c0_i32, %c0_i32_0 : i32, i32
  }
  func.func @transform_2(%arg0: i32) -> (i32, i32) {
    %c0_i32 = arith.constant 0 : i32
    %c0_i32_0 = arith.constant 0 : i32
    return %arg0, %c0_i32 : i32, i32
  }
}

</mosaic_0001>

<bundles_post_ra>
// kernel: tpu_custom_call.1
= control target key start
LH: loop header
LB: loop body
LE: loop exit
PB: predicated region body
PF: predicated region fallthrough
CT: control target
= control target key end

     0   :  { %7 = vsyncpa [#allocation3], 0  ;;  %s201_s0 = inlined_call_operand.hbm [shape: bf16[16,32], index: 0, kind: input, shape index: {}]   ;;  %s202_s1 = inlined_call_operand.vmem [shape: f32[1,32], index: 1, kind: input, shape index: {}]   ;;  %s203_s2 = inlined_call_operand.hbm [shape: bf16[16,32], index: 2, kind: output, shape index: {}]  }
   0x1   :  { %8 = vsyncpa [#allocation4], 0  ;;  %s149_s9 = smov [#allocation2]   ;;  %s101_s13 = scalar_lea.hbm %s201_s0, 128 }
   0x2   :  { %s14_s10 = sshll.u32 %s149_s9, 4  ;;  %p102_p0 = scmp.ne.s32.totalorder %s201_s0, %s101_s13  ;;  %s15_s10 = int_to_ptr.vmem [resolvable:$true] %s14_s10 }
   0x3   :  { %p105_p1 = scmp.lt.u32.totalorder %s101_s13, %s201_s0 }
   0x5   :  { %p107_p2 = pnand %p105_p1, %p102_p0 }
   0x7   :  { %110 = shalt.err (!%p107_p2)
}
   0x8   :  { %s111_s18 = scalar_lea.vmem %s15_s10, 128  ;;  %p116_p4 = scmp.lt.s32.totalorder %s15_s10, %s15_s10 }
   0x9   :  { %p112_p3 = scmp.ne.s32.totalorder %s15_s10, %s111_s18  ;;  %p117_p5 = scmp.lt.s32.totalorder %s111_s18, %s111_s18 }
   0xb   :  { %p118_p6 = por %p117_p5, %p116_p4 }
   0xd   :  { %p119_p7 = pnand %p118_p6, %p112_p3 }
   0xf   :  { %122 = shalt.err (!%p119_p7)
}
  0x10   :  { %s150_s19 = smov 64   ;;  %s151_s20 = smov 4  }
  0x11   :  { %20 = dma.hbm_to_vmem [thread:$0]  %s201_s0, 128, %s15_s10, [#allocation3], %s150_s19, %s150_s19, %s151_s20  }
  0x12   :  { %145 = dma.done.wait [#allocation3], 128  }
  0x13   :  { %146 = vsyncadd [#allocation3], 4294967168  ;;  %v90_v0 = vld [vmem:[#allocation2] sm:$0xff]   ;;  %vm32_vm0 = vcmask 261120   ;;  %vm64_vm1 = vcmask 257024   ;;  %s152_s24 = smov [#allocation5]  }
  0x14   :  { %v91_v1 = vunpack.c.l.bf16 %v90_v0  ;;  %v92_v2 = vunpack.c.h.bf16 %v90_v0  ;;  %v84_v14 = vld [vmem:[%s202_s1] ss:$0 sm:$0xff]  ;;  %s72_s25 = sshll.u32 %s152_s24, 4  ;;  %s73_s25 = int_to_ptr.vmem [resolvable:$true] %s72_s25 }
  0x15   :  { %s123_s26 = scalar_lea.vmem %s73_s25, 128  ;;  %p128_p9 = scmp.lt.s32.totalorder %s73_s25, %s73_s25 }
  0x16   :  { %v30_v3 = vmul.f32 %v91_v1, %v91_v1  ;;  %v31_v4 = vmul.f32 %v92_v2, %v92_v2  ;;  %p124_p8 = scmp.ne.s32.totalorder %s73_s25, %s123_s26  ;;  %p129_p10 = scmp.lt.s32.totalorder %s123_s26, %s123_s26 }
  0x18   :  { %v33_v5 = vsel %vm32_vm0, %v30_v3, 0.0  ;;  %v36_v6 = vsel %vm32_vm0, %v31_v4, 0.0  ;;  %p130_p11 = por %p129_p10, %p128_p9 }
  0x19   :  { %34 = vadd.xlane.f32.xlu0 %v33_v5 }
  0x1a   :  { %p131_p12 = pnand %p130_p11, %p124_p8 }
  0x1d   :  { %37 = vadd.xlane.f32.xlu0 %v36_v6 }
  0xa6   :  { %v35_v7 = vpop.xlane.xlu0 %34 }
  0xa7   :  { %v39_v8 = vmul.f32 0.03125, %v35_v7 }
  0xa9   :  { %v41_v9 = vadd.f32 1e-06, %v39_v8 }
  0xaa   :  { %v38_v10 = vpop.xlane.xlu0 %37 }
  0xab   :  { %97 = vrsqrt.f32 %v41_v9  ;;  %v40_v11 = vmul.f32 0.03125, %v38_v10 }
  0xad   :  { %v42_v12 = vadd.f32 1e-06, %v40_v11 }
  0xaf   :  { %99 = vrsqrt.f32 %v42_v12 }
  0xb5   :  { %v98_v13 = vpop.eup %97 }
  0xb6   :  { %v45_v15 = vmul.f32 %v98_v13, %v91_v1 }
  0xb8   :  { %v54_v16 = vmul.f32 %v84_v14, %v45_v15 }
  0xb9   :  { %v100_v17 = vpop.eup %99 }
  0xba   :  { %v46_v18 = vmul.f32 %v100_v17, %v92_v2  ;;  %v87_v19 = vpack.c.bf16 %v54_v16, %v54_v16 }
  0xbc   :  { %v55_v20 = vmul.f32 %v84_v14, %v46_v18  ;;  %65 = vst.msk [vmem:[#allocation5] sm:$0xf] %vm64_vm1, %v87_v19 }
  0xbe   :  { %v88_v21 = vpack.c.bf16 %v55_v20, %v55_v20 }
  0xc0   :  { %66 = vst.msk [vmem:[#allocation5 + $0x4] sm:$0xf] %vm64_vm1, %v88_v21 }
  0xc1   :  { %134 = shalt.err (!%p131_p12)
}
  0xc2   :  { %s135_s28 = scalar_lea.hbm %s203_s2, 128 }
  0xc3   :  { %p136_p13 = scmp.ne.s32.totalorder %s203_s2, %s135_s28  ;;  %p139_p0 = scmp.lt.u32.totalorder %s135_s28, %s203_s2 }
  0xc5   :  { %p141_p1 = pnand %p139_p0, %p136_p13 }
  0xc7   :  { %144 = shalt.err (!%p141_p1)
}
  0xc8   :  { %78 = dma.vmem_to_hbm [thread:$0]  %s73_s25, 128, %s203_s2, [#allocation4], %s150_s19, %s150_s19, %s151_s20  }
  0xc9   :  { %147 = dma.done.wait [#allocation4], 128  }
  0xca   :  { %148 = vsyncadd [#allocation4], 4294967168 }
  0xcb   :  { %82 = vsyncpa [#allocation3], 1 }
  0xcc   :  { %83 = vsyncpa [#allocation4], 1 }

</bundles_post_ra>
